<compile_context>
chip_gen: v7x
topology: tpu7x:2x2x1
jax: 0.10.0
libtpu: 0.0.40
codegen_flags: <defaults>
</compile_context>

<pallas_src>
import functools

import jax
import jax.numpy as jnp
from jax.experimental import pallas as pl
from jax.experimental.pallas import tpu as pltpu

LANE = 128


def _round_up(x, m):
    return ((x + m - 1) // m) * m


def _pad_flat_2d(x, rows, pad_value):
    """Flatten x, pad to rows*LANE elements with pad_value, reshape (rows, LANE)."""
    flat = x.reshape(-1)
    total = rows * LANE
    n = flat.shape[0]
    if total > n:
        flat = jnp.pad(flat, (0, total - n), constant_values=pad_value)
    return flat.reshape(rows, LANE)


# ---------------------------------------------------------------------------
# Fused kernel: tiled mel reduction + (once-per-slab) gate BCE.
# ---------------------------------------------------------------------------
def _tacotron2_loss_kernel(mo_ref, mp_ref, mt_ref, gx_ref, gy_ref,
                           mel_ref, gate_ref, acc_ref,
                           *, loss_type, pos_weight):
    k = pl.program_id(1)  # reduction step within this slab

    @pl.when(k == 0)
    def _init():
        acc_ref[0] = jnp.float32(0.0)
        # Gate BCEWithLogits (pos_weight), numerically stable:
        #   loss = pw*y*softplus(-x) + (1-y)*(x + softplus(-x))
        # Tiny tensors, resident block -> free filler under the mel DMA.
        x = gx_ref[...].astype(jnp.float32)
        y = gy_ref[...].astype(jnp.float32)
        sp_neg_x = jnp.maximum(-x, 0.0) + jnp.log1p(jnp.exp(-jnp.abs(x)))
        gl = jnp.float32(pos_weight) * y * sp_neg_x + (1.0 - y) * (x + sp_neg_x)
        gate_ref[0, 0] = jnp.sum(gl)

    # Mel tile: upcast per-tile only, one fused cross-lane reduction per tile.
    mo = mo_ref[...].astype(jnp.float32)
    mp = mp_ref[...].astype(jnp.float32)
    mt = mt_ref[...].astype(jnp.float32)
    d1 = mo - mt
    d2 = mp - mt
    if loss_type == "MSE":
        part = jnp.sum(d1 * d1 + d2 * d2)
    else:  # "L1"
        part = jnp.sum(jnp.abs(d1) + jnp.abs(d2))
    acc_ref[0] = acc_ref[0] + part

    @pl.when(k == pl.num_programs(1) - 1)
    def _finalize():
        mel_ref[0, 0] = acc_ref[0]


# ---------------------------------------------------------------------------
# Wrapper (the Tacotron2Loss.forward equivalent)
# ---------------------------------------------------------------------------
def tacotron2_loss(mels_out, mels_postnet_out, gate_out, mels_target, gate_target,
                   *, mel_loss_type="MSE", gate_positive_weight=5.0,
                   block_rows=1024, num_slabs=2):
    assert mel_loss_type in ("MSE", "L1")
    n_mel = mels_target.size
    n_gate = gate_target.size

    # ---- mel geometry: lane-dense padded view + (slab, step) tiling --------
    rows = -(-n_mel // LANE)
    blk = min(block_rows, _round_up(rows, 8))
    blocks_needed = -(-rows // blk)
    slabs = num_slabs if blocks_needed >= num_slabs else 1
    blocks_per_slab = -(-blocks_needed // slabs)
    padded_rows = slabs * blocks_per_slab * blk

    # Zero-padding contributes exactly 0 to both MSE and L1 sums.
    mo2 = _pad_flat_2d(mels_out, padded_rows, 0)
    mp2 = _pad_flat_2d(mels_postnet_out, padded_rows, 0)
    mt2 = _pad_flat_2d(mels_target, padded_rows, 0)

    # ---- gate geometry: lane-dense padded view (no (N,1) layout) ------------
    g_rows = _round_up(-(-n_gate // LANE), 8)
    # (logit=-1e4, target=0) -> x + softplus(-x) == 0 exactly: padding adds 0.
    gx2 = _pad_flat_2d(gate_out, g_rows, -1e4)
    gy2 = _pad_flat_2d(gate_target, g_rows, 0)

    kernel = functools.partial(
        _tacotron2_loss_kernel,
        loss_type=mel_loss_type,
        pos_weight=float(gate_positive_weight))

    mel_spec = pl.BlockSpec((blk, LANE), lambda s, k: (s * blocks_per_slab + k, 0))
    gate_spec = pl.BlockSpec((g_rows, LANE), lambda s, k: (0, 0))  # resident
    smem_out_spec = pl.BlockSpec((1, 1), lambda s, k: (s, 0),
                                 memory_space=pltpu.MemorySpace.SMEM)

    mel_parts, gate_parts = pl.pallas_call(
        kernel,
        grid=(slabs, blocks_per_slab),
        in_specs=[mel_spec, mel_spec, mel_spec, gate_spec, gate_spec],
        out_specs=[smem_out_spec, smem_out_spec],
        out_shape=[jax.ShapeDtypeStruct((slabs, 1), jnp.float32),
                   jax.ShapeDtypeStruct((slabs, 1), jnp.float32)],
        scratch_shapes=[pltpu.SMEM((1,), jnp.float32)],
        compiler_params=pltpu.CompilerParams(
            dimension_semantics=("parallel", "arbitrary")),
    )(mo2, mp2, mt2, gx2, gy2)

    # Finish the (tiny) cross-slab sum + mean divides in plain JAX.
    mel_loss = jnp.sum(mel_parts) / jnp.float32(n_mel)
    gate_loss = gate_parts[0, 0] / jnp.float32(n_gate)
    return mel_loss, gate_loss


# ---------------------------------------------------------------------------
# Pure-JAX reference (for a silent correctness check)
# ---------------------------------------------------------------------------
def _reference(mels_out, mels_postnet_out, gate_out, mels_target, gate_target,
               mel_loss_type="MSE", gate_positive_weight=5.0):
    mo = mels_out.astype(jnp.float32)
    mp = mels_postnet_out.astype(jnp.float32)
    mt = mels_target.astype(jnp.float32)
    if mel_loss_type == "MSE":
        mel = jnp.mean((mo - mt) ** 2) + jnp.mean((mp - mt) ** 2)
    else:
        mel = jnp.mean(jnp.abs(mo - mt)) + jnp.mean(jnp.abs(mp - mt))
    x = gate_out.astype(jnp.float32).reshape(-1, 1)
    y = gate_target.astype(jnp.float32).reshape(-1, 1)
    sp = jnp.maximum(-x, 0.0) + jnp.log1p(jnp.exp(-jnp.abs(x)))
    gate = jnp.mean(gate_positive_weight * y * sp + (1.0 - y) * (x + sp))
    return mel, gate


# ---------------------------------------------------------------------------
if __name__ == "__main__":
    def _make_inputs(key, B, n_mels, T, dtype):
        k1, k2, k3, k4, k5 = jax.random.split(key, 5)
        mels_out = jax.random.normal(k1, (B, n_mels, T), dtype=dtype)
        mels_postnet_out = jax.random.normal(k2, (B, n_mels, T), dtype=dtype)
        mels_target = jax.random.normal(k3, (B, n_mels, T), dtype=dtype)
        gate_out = jax.random.normal(k4, (B, T), dtype=dtype)
        gate_target = (jax.random.uniform(k5, (B, T)) > 0.7).astype(dtype)
        return mels_out, mels_postnet_out, gate_out, mels_target, gate_target

    key = jax.random.PRNGKey(0)
    ka, kb, kc = jax.random.split(key, 3)

    cases = [
        # (inputs, loss_type)   -- small shapes consistent with the module
        (_make_inputs(ka, 2, 8, 16, jnp.float32), "MSE"),
        (_make_inputs(kb, 2, 8, 16, jnp.float32), "L1"),
        # larger case exercises multi-block tiling, 2-slab split, and padding
        (_make_inputs(kc, 4, 80, 430, jnp.float32), "MSE"),
    ]

    gate_positive_weight = 5.0
    for (mo, mp, go, mt, gt), loss_type in cases:
        mel_loss, gate_loss = tacotron2_loss(
            mo, mp, go, mt, gt,
            mel_loss_type=loss_type,
            gate_positive_weight=gate_positive_weight)
        mel_loss = jax.block_until_ready(mel_loss)
        gate_loss = jax.block_until_ready(gate_loss)

        mel_ref, gate_ref = _reference(
            mo, mp, go, mt, gt, loss_type, gate_positive_weight)
        assert jnp.allclose(mel_loss, mel_ref, rtol=1e-4, atol=1e-5), (
            loss_type, float(mel_loss), float(mel_ref))
        assert jnp.allclose(gate_loss, gate_ref, rtol=1e-4, atol=1e-5), (
            loss_type, float(gate_loss), float(gate_ref))

    print("KERNEL_OK")
</pallas_src>

<mosaic_0001>
module attributes {stable_mosaic.version = 11 : i64} {
  func.func @_tacotron2_loss_kernel(%arg0: i32, %arg1: i32, %arg2: memref<8x128xf32, #tpu.memory_space<vmem>>, %arg3: memref<8x128xf32, #tpu.memory_space<vmem>>, %arg4: memref<8x128xf32, #tpu.memory_space<vmem>>, %arg5: memref<8x128xf32, #tpu.memory_space<vmem>>, %arg6: memref<8x128xf32, #tpu.memory_space<vmem>>, %arg7: memref<1x1xf32, #tpu.memory_space<smem>>, %arg8: memref<1x1xf32, #tpu.memory_space<smem>>, %arg9: memref<1xf32, #tpu.memory_space<smem>>) attributes {dimension_semantics = [#tpu.dimension_semantics<parallel>, #tpu.dimension_semantics<arbitrary>], iteration_bounds = array<i64: 1, 1>, scalar_prefetch = 0 : i64, scratch_operands = 1 : i64, tpu.core_type = #tpu.core_type<tc>, window_params = [{transform_indices = @transform_0, window_bounds = array<i64: 8, 128>}, {transform_indices = @transform_1, window_bounds = array<i64: 8, 128>}, {transform_indices = @transform_2, window_bounds = array<i64: 8, 128>}, {pipeline_mode = #tpu.pipeline_mode<synchronous>, transform_indices = @transform_3, window_bounds = array<i64: 8, 128>}, {pipeline_mode = #tpu.pipeline_mode<synchronous>, transform_indices = @transform_4, window_bounds = array<i64: 8, 128>}, {transform_indices = @transform_5, window_bounds = array<i64: 1, 1>}, {transform_indices = @transform_6, window_bounds = array<i64: 1, 1>}]} {
    %c0_i32 = arith.constant 0 : i32
    %0 = arith.cmpi eq, %arg1, %c0_i32 : i32
    %1 = arith.extui %0 : i1 to i32
    %c0_i32_0 = arith.constant 0 : i32
    %2 = arith.cmpi ne, %1, %c0_i32_0 : i32
    scf.if %2 {
      %cst_10 = arith.constant 0.000000e+00 : f32
      %c0_11 = arith.constant 0 : index
      %21 = memref.load %arg9[%c0_11] : memref<1xf32, #tpu.memory_space<smem>>
      memref.store %cst_10, %arg9[%c0_11] : memref<1xf32, #tpu.memory_space<smem>>
      %c0_12 = arith.constant 0 : index
      %c0_13 = arith.constant 0 : index
      %22 = vector.load %arg5[%c0_12, %c0_13] : memref<8x128xf32, #tpu.memory_space<vmem>>, vector<8x128xf32>
      %c0_14 = arith.constant 0 : index
      %c0_15 = arith.constant 0 : index
      %23 = vector.load %arg6[%c0_14, %c0_15] : memref<8x128xf32, #tpu.memory_space<vmem>>, vector<8x128xf32>
      %cst_16 = arith.constant 0.000000e+00 : f32
      %24 = vector.broadcast %cst_16 : f32 to vector<8x128xf32>
      %25 = arith.subf %24, %22 : vector<8x128xf32>
      %cst_17 = arith.constant 0.000000e+00 : f32
      %26 = vector.broadcast %cst_17 : f32 to vector<8x128xf32>
      %27 = arith.maximumf %25, %26 : vector<8x128xf32>
      %28 = math.absf %22 : vector<8x128xf32>
      %cst_18 = arith.constant 0.000000e+00 : f32
      %29 = vector.broadcast %cst_18 : f32 to vector<8x128xf32>
      %30 = arith.subf %29, %28 : vector<8x128xf32>
      %31 = math.exp %30 : vector<8x128xf32>
      %32 = math.log1p %31 : vector<8x128xf32>
      %33 = arith.addf %27, %32 : vector<8x128xf32>
      %cst_19 = arith.constant 5.000000e+00 : f32
      %34 = vector.broadcast %cst_19 : f32 to vector<8x128xf32>
      %35 = arith.mulf %34, %23 : vector<8x128xf32>
      %36 = arith.mulf %35, %33 : vector<8x128xf32>
      %cst_20 = arith.constant 1.000000e+00 : f32
      %37 = vector.broadcast %cst_20 : f32 to vector<8x128xf32>
      %38 = arith.subf %37, %23 : vector<8x128xf32>
      %39 = arith.addf %22, %33 : vector<8x128xf32>
      %40 = arith.mulf %38, %39 : vector<8x128xf32>
      %41 = arith.addf %36, %40 : vector<8x128xf32>
      %42 = vector.shape_cast %41 : vector<8x128xf32> to vector<1x8x128xf32>
      %cst_21 = arith.constant dense<0.000000e+00> : vector<1xf32>
      %43 = vector.multi_reduction <add>, %42, %cst_21 [1, 2] : vector<1x8x128xf32> to vector<1xf32>
      %44 = vector.shape_cast %43 : vector<1xf32> to vector<1x1x1xf32>
      %45 = vector.extract %44[0, 0, 0] : f32 from vector<1x1x1xf32>
      %c0_22 = arith.constant 0 : index
      %c0_23 = arith.constant 0 : index
      %46 = memref.load %arg8[%c0_22, %c0_23] : memref<1x1xf32, #tpu.memory_space<smem>>
      memref.store %45, %arg8[%c0_22, %c0_23] : memref<1x1xf32, #tpu.memory_space<smem>>
    } else {
    }
    %c0 = arith.constant 0 : index
    %c0_1 = arith.constant 0 : index
    %3 = vector.load %arg2[%c0, %c0_1] : memref<8x128xf32, #tpu.memory_space<vmem>>, vector<8x128xf32>
    %c0_2 = arith.constant 0 : index
    %c0_3 = arith.constant 0 : index
    %4 = vector.load %arg3[%c0_2, %c0_3] : memref<8x128xf32, #tpu.memory_space<vmem>>, vector<8x128xf32>
    %c0_4 = arith.constant 0 : index
    %c0_5 = arith.constant 0 : index
    %5 = vector.load %arg4[%c0_4, %c0_5] : memref<8x128xf32, #tpu.memory_space<vmem>>, vector<8x128xf32>
    %6 = arith.subf %3, %5 : vector<8x128xf32>
    %7 = arith.subf %4, %5 : vector<8x128xf32>
    %8 = arith.mulf %6, %6 : vector<8x128xf32>
    %9 = arith.mulf %7, %7 : vector<8x128xf32>
    %10 = arith.addf %8, %9 : vector<8x128xf32>
    %11 = vector.shape_cast %10 : vector<8x128xf32> to vector<1x8x128xf32>
    %cst = arith.constant dense<0.000000e+00> : vector<1xf32>
    %12 = vector.multi_reduction <add>, %11, %cst [1, 2] : vector<1x8x128xf32> to vector<1xf32>
    %13 = vector.shape_cast %12 : vector<1xf32> to vector<1x1x1xf32>
    %14 = vector.extract %13[0, 0, 0] : f32 from vector<1x1x1xf32>
    %c0_6 = arith.constant 0 : index
    %15 = memref.load %arg9[%c0_6] : memref<1xf32, #tpu.memory_space<smem>>
    %16 = arith.addf %15, %14 : f32
    %c0_7 = arith.constant 0 : index
    %17 = memref.load %arg9[%c0_7] : memref<1xf32, #tpu.memory_space<smem>>
    memref.store %16, %arg9[%c0_7] : memref<1xf32, #tpu.memory_space<smem>>
    %c0_i32_8 = arith.constant 0 : i32
    %18 = arith.cmpi eq, %arg1, %c0_i32_8 : i32
    %19 = arith.extui %18 : i1 to i32
    %c0_i32_9 = arith.constant 0 : i32
    %20 = arith.cmpi ne, %19, %c0_i32_9 : i32
    scf.if %20 {
      %c0_10 = arith.constant 0 : index
      %21 = memref.load %arg9[%c0_10] : memref<1xf32, #tpu.memory_space<smem>>
      %c0_11 = arith.constant 0 : index
      %c0_12 = arith.constant 0 : index
      %22 = memref.load %arg7[%c0_11, %c0_12] : memref<1x1xf32, #tpu.memory_space<smem>>
      memref.store %21, %arg7[%c0_11, %c0_12] : memref<1x1xf32, #tpu.memory_space<smem>>
    } else {
    }
    return
  }
  func.func @transform_0(%arg0: i32, %arg1: i32) -> (i32, i32) {
    %c1_i32 = arith.constant 1 : i32
    %0 = arith.muli %arg0, %c1_i32 : i32
    %1 = arith.addi %0, %arg1 : i32
    %c0_i32 = arith.constant 0 : i32
    %c0_i32_0 = arith.constant 0 : i32
    return %1, %c0_i32 : i32, i32
  }
  func.func @transform_1(%arg0: i32, %arg1: i32) -> (i32, i32) {
    %c1_i32 = arith.constant 1 : i32
    %0 = arith.muli %arg0, %c1_i32 : i32
    %1 = arith.addi %0, %arg1 : i32
    %c0_i32 = arith.constant 0 : i32
    %c0_i32_0 = arith.constant 0 : i32
    return %1, %c0_i32 : i32, i32
  }
  func.func @transform_2(%arg0: i32, %arg1: i32) -> (i32, i32) {
    %c1_i32 = arith.constant 1 : i32
    %0 = arith.muli %arg0, %c1_i32 : i32
    %1 = arith.addi %0, %arg1 : i32
    %c0_i32 = arith.constant 0 : i32
    %c0_i32_0 = arith.constant 0 : i32
    return %1, %c0_i32 : i32, i32
  }
  func.func @transform_3(%arg0: i32, %arg1: i32) -> (i32, i32) {
    %c0_i32 = arith.constant 0 : i32
    %c0_i32_0 = arith.constant 0 : i32
    %c0_i32_1 = arith.constant 0 : i32
    return %c0_i32, %c0_i32_0 : i32, i32
  }
  func.func @transform_4(%arg0: i32, %arg1: i32) -> (i32, i32) {
    %c0_i32 = arith.constant 0 : i32
    %c0_i32_0 = arith.constant 0 : i32
    %c0_i32_1 = arith.constant 0 : i32
    return %c0_i32, %c0_i32_0 : i32, i32
  }
  func.func @transform_5(%arg0: i32, %arg1: i32) -> (i32, i32) {
    %c0_i32 = arith.constant 0 : i32
    %c0_i32_0 = arith.constant 0 : i32
    return %arg0, %c0_i32 : i32, i32
  }
  func.func @transform_6(%arg0: i32, %arg1: i32) -> (i32, i32) {
    %c0_i32 = arith.constant 0 : i32
    %c0_i32_0 = arith.constant 0 : i32
    return %arg0, %c0_i32 : i32, i32
  }
}

</mosaic_0001>

<bundles_post_ra>
// kernel: tpu_custom_call.1
= control target key start
LH: loop header
LB: loop body
LE: loop exit
PB: predicated region body
PF: predicated region fallthrough
CT: control target
= control target key end

     0   :  { %12 = vsyncpa [#allocation4], 0  ;;  %s427_s0 = inlined_call_operand.hbm [shape: f32[8,128], index: 0, kind: input, shape index: {}]   ;;  %s428_s1 = inlined_call_operand.hbm [shape: f32[8,128], index: 1, kind: input, shape index: {}]   ;;  %s429_s2 = inlined_call_operand.hbm [shape: f32[8,128], index: 2, kind: input, shape index: {}]   ;;  %s430_s3 = inlined_call_operand.vmem [shape: f32[8,128], index: 3, kind: input, shape index: {}]   ;;  %s431_s4 = inlined_call_operand.hbm [shape: f32[8,128], index: 4, kind: input, shape index: {}]   ;;  %s432_s5 = inlined_call_operand.hbm [shape: f32[1,1], index: 5, kind: output, shape index: {0}]   ;;  %s433_s6 = inlined_call_operand.hbm [shape: f32[1,1], index: 6, kind: output, shape index: {1}]  }
   0x1   :  { %13 = vsyncpa [#allocation7], 0 }
   0x2   :  { %14 = vsyncpa [#allocation10], 0 }
   0x3   :  { %15 = vsyncpa [#allocation5], 0 }
   0x4   :  { %16 = vsyncpa [#allocation13], 0  ;;  %s311_s21 = smov [#allocation6]   ;;  %s312_s23 = smov [#allocation3]  }
   0x5   :  { %s39_s22 = sshll.u32 %s311_s21, 4  ;;  %s26_s24 = sshll.u32 %s312_s23, 4  ;;  %s40_s22 = int_to_ptr.vmem [resolvable:$true] %s39_s22  ;;  %s27_s24 = int_to_ptr.vmem [resolvable:$true] %s26_s24 }
   0x6   :  { %s193_s27 = scalar_lea.hbm %s428_s1, 128 }
   0x7   :  { %p194_p0 = scmp.ne.s32.totalorder %s428_s1, %s193_s27  ;;  %p197_p1 = scmp.lt.u32.totalorder %s193_s27, %s428_s1 }
   0x9   :  { %p199_p2 = pnand %p197_p1, %p194_p0 }
   0xb   :  { %202 = shalt.err (!%p199_p2)
}
   0xc   :  { %s203_s8 = scalar_lea.vmem %s40_s22, 128  ;;  %p208_p4 = scmp.lt.s32.totalorder %s40_s22, %s40_s22 }
   0xd   :  { %p204_p3 = scmp.ne.s32.totalorder %s40_s22, %s203_s8  ;;  %p209_p5 = scmp.lt.s32.totalorder %s203_s8, %s203_s8 }
   0xf   :  { %p210_p6 = por %p209_p5, %p208_p4 }
  0x11   :  { %p211_p7 = pnand %p210_p6, %p204_p3 }
  0x13   :  { %214 = shalt.err (!%p211_p7)
}
  0x14   :  { %42 = dma.hbm_to_vmem [thread:$0]  %s428_s1, 128, %s40_s22, [#allocation7]  }
  0x15   :  { %s215_s13 = scalar_lea.hbm %s427_s0, 128 }
  0x16   :  { %p216_p8 = scmp.ne.s32.totalorder %s427_s0, %s215_s13  ;;  %p219_p9 = scmp.lt.u32.totalorder %s215_s13, %s427_s0 }
  0x18   :  { %p221_p10 = pnand %p219_p9, %p216_p8 }
  0x1a   :  { %224 = shalt.err (!%p221_p10)
}
  0x1b   :  { %s225_s18 = scalar_lea.vmem %s27_s24, 128  ;;  %p230_p12 = scmp.lt.s32.totalorder %s27_s24, %s27_s24 }
  0x1c   :  { %p226_p11 = scmp.ne.s32.totalorder %s27_s24, %s225_s18  ;;  %p231_p13 = scmp.lt.s32.totalorder %s225_s18, %s225_s18 }
  0x1e   :  { %p232_p0 = por %p231_p13, %p230_p12 }
  0x20   :  { %p233_p1 = pnand %p232_p0, %p226_p11 }
  0x22   :  { %236 = shalt.err (!%p233_p1)
}
  0x23   :  { %29 = dma.hbm_to_vmem [thread:$0]  %s427_s0, 128, %s27_s24, [#allocation4]  }
  0x24   :  { %s313_s20 = smov [#allocation8]   ;;  %s314_s22 = smov [#allocation9]  }
  0x25   :  { %s52_s21 = sshll.u32 %s313_s20, 4  ;;  %s64_s23 = sshll.u32 %s314_s22, 4  ;;  %s53_s21 = int_to_ptr.vmem [resolvable:$true] %s52_s21  ;;  %s65_s23 = int_to_ptr.vmem [resolvable:$true] %s64_s23 }
  0x26   :  { %s237_s27 = scalar_lea.hbm %s429_s2, 128 }
  0x27   :  { %p238_p2 = scmp.ne.s32.totalorder %s429_s2, %s237_s27  ;;  %p241_p3 = scmp.lt.u32.totalorder %s237_s27, %s429_s2 }
  0x29   :  { %p243_p4 = pnand %p241_p3, %p238_p2 }
  0x2b   :  { %246 = shalt.err (!%p243_p4)
}
  0x2c   :  { %s247_s0 = scalar_lea.vmem %s53_s21, 128  ;;  %p252_p6 = scmp.lt.s32.totalorder %s53_s21, %s53_s21 }
  0x2d   :  { %p248_p5 = scmp.ne.s32.totalorder %s53_s21, %s247_s0  ;;  %p253_p7 = scmp.lt.s32.totalorder %s247_s0, %s247_s0 }
  0x2f   :  { %p254_p8 = por %p253_p7, %p252_p6 }
  0x31   :  { %p255_p9 = pnand %p254_p8, %p248_p5 }
  0x33   :  { %258 = shalt.err (!%p255_p9)
}
  0x34   :  { %55 = dma.hbm_to_vmem [thread:$0]  %s429_s2, 128, %s53_s21, [#allocation7]  }
  0x35   :  { %s259_s11 = scalar_lea.hbm %s431_s4, 128 }
  0x36   :  { %p260_p10 = scmp.ne.s32.totalorder %s431_s4, %s259_s11  ;;  %p263_p11 = scmp.lt.u32.totalorder %s259_s11, %s431_s4 }
  0x38   :  { %p265_p12 = pnand %p263_p11, %p260_p10 }
  0x3a   :  { %268 = shalt.err (!%p265_p12)
}
  0x3b   :  { %s269_s16 = scalar_lea.vmem %s65_s23, 128  ;;  %p274_p0 = scmp.lt.s32.totalorder %s65_s23, %s65_s23 }
  0x3c   :  { %p270_p13 = scmp.ne.s32.totalorder %s65_s23, %s269_s16  ;;  %p275_p1 = scmp.lt.s32.totalorder %s269_s16, %s269_s16 }
  0x3e   :  { %p276_p2 = por %p275_p1, %p274_p0 }
  0x40   :  { %p277_p3 = pnand %p276_p2, %p270_p13 }
  0x42   :  { %280 = shalt.err (!%p277_p3)
}
  0x43   :  { %67 = dma.hbm_to_vmem [thread:$0]  %s431_s4, 128, %s65_s23, [#allocation10]  }
  0x44   :  { %301 = dma.done.wait [#allocation4], 128  }
  0x45   :  { %302 = vsyncadd [#allocation4], 4294967168 }
  0x46   :  { %303 = dma.done.wait [#allocation7], 256  }
  0x47   :  { %304 = vsyncadd [#allocation7], 4294967040 }
  0x48   :  { %305 = dma.done.wait [#allocation10], 128  }
  0x49   :  { %306 = vsyncadd [#allocation10], 4294967168  ;;  %v89_v0 = vld [vmem:[%s430_s3] sm:$0xff]  ;;  %v90_v10 = vld [vmem:[#allocation9] sm:$0xff]  ;;  %s281_s20 = scalar_lea.hbm %s433_s6, 16 }
  0x4a   :  { %v93_v1 = vand.u32 2147483647, %v89_v0  ;;  %v91_v8 = vsub.f32 0.0, %v89_v0  ;;  %v124_v15 = vld [vmem:[#allocation3] sm:$0xff]  ;;  %v125_v16 = vld [vmem:[#allocation6] sm:$0xff]  ;;  %v126_v17 = vld [vmem:[#allocation8] sm:$0xff]  ;;  %p282_p4 = scmp.ne.s32.totalorder %s433_s6, %s281_s20  ;;  %p285_p5 = scmp.lt.u32.totalorder %s281_s20, %s433_s6 }
  0x4b   :  { %v107_v18 = vmul.f32 5.0, %v90_v10  ;;  %v109_v21 = vsub.f32 1.0, %v90_v10  ;;  %v127_v22 = vsub.f32 %v124_v15, %v126_v17  ;;  %v128_v23 = vsub.f32 %v125_v16, %v126_v17 }
  0x4c   :  { %v94_v2 = vsub.f32 0.0, %v93_v1  ;;  %v92_v13 = vmax.f32 %v91_v8, 0.0  ;;  %p287_p6 = pnand %p285_p5, %p282_p4 }
  0x4d   :  { %v129_v27 = vmul.f32 %v127_v22, %v127_v22  ;;  %v130_v28 = vmul.f32 %v128_v23, %v128_v23 }
  0x4e   :  { %v95_v3 = vmul.f32 1.442695, %v94_v2 }
  0x4f   :  { %v131_v30 = vadd.f32 %v130_v28, %v129_v27 }
  0x50   :  { %189 = vpow2.f32 %v95_v3 }
  0x5a   :  { %v190_v4 = vpop.eup %189 }
  0x5b   :  { %v97_v5 = vadd.f32 1.0, %v190_v4  ;;  %v100_v6 = vmul.f32 -0.5, %v190_v4  ;;  %v103_v9 = vand.u32 2147483647, %v190_v4 }
  0x5d   :  { %191 = vlog2.f32 %v97_v5  ;;  %v101_v7 = vadd.f32 1.0, %v100_v6  ;;  %vm104_vm0 = vcmp.lt.f32.partialorder %v103_v9, 0.0004427343 }
  0x5f   :  { %v102_v11 = vmul.f32 %v190_v4, %v101_v7 }
  0x67   :  { %v192_v12 = vpop.eup %191 }
  0x68   :  { %v99_v14 = vmul.f32 0.6931472, %v192_v12 }
  0x6a   :  { %v105_v19 = vsel %vm104_vm0, %v102_v11, %v99_v14 }
  0x6b   :  { %v106_v20 = vadd.f32 %v105_v19, %v92_v13 }
  0x6d   :  { %v108_v24 = vmul.f32 %v107_v18, %v106_v20  ;;  %v110_v25 = vadd.f32 %v106_v20, %v89_v0 }
  0x6f   :  { %v111_v26 = vmul.f32 %v110_v25, %v109_v21 }
  0x71   :  { %v112_v29 = vadd.f32 %v111_v26, %v108_v24 }
  0x73   :  { %113 = vadd.xlane.f32.xlu0 %v112_v29 }
  0x77   :  { %132 = vadd.xlane.f32.xlu0 %v131_v30 }
 0x100   :  { %v114_v31 = vpop.xlane.xlu0 %113 }
 0x101   :  { %v115_v32 = vrot.slane %v114_v31, 4 }
 0x103   :  { %v116_v33 = vadd.f32 %v115_v32, %v114_v31 }
 0x104   :  { %v133_v34 = vpop.xlane.xlu0 %132 }
 0x105   :  { %v117_v35 = vrot.slane %v116_v33, 2  ;;  %v134_v36 = vrot.slane %v133_v34, 4 }
 0x107   :  { %v135_v37 = vadd.f32 %v134_v36, %v133_v34  ;;  %v118_v38 = vadd.f32 %v117_v35, %v116_v33 }
 0x109   :  { %v136_v39 = vrot.slane %v135_v37, 2  ;;  %v119_v40 = vrot.slane %v118_v38, 1 }
 0x10b   :  { %v137_v41 = vadd.f32 %v136_v39, %v135_v37  ;;  %v120_v42 = vadd.f32 %v119_v40, %v118_v38 }
 0x10d   :  { %179 = vpush %v120_v42  ;;  %v138_v43 = vrot.slane %v137_v41, 1 }
 0x10f   :  { %v139_v44 = vadd.f32 %v138_v43, %v137_v41 }
 0x111   :  { %181 = vpush %v139_v44 }
 0x13e   :  { %s180_s3 = spop %179 }
 0x13f   :  { %123 = sst [smem:[#allocation12]] %s180_s3 }
 0x140   :  { %290 = shalt.err (!%p287_p6)
}
 0x141   :  { %s315_s26 = smov [#allocation12]   ;;  %s291_s0 = scalar_lea.hbm %s432_s5, 16 }
 0x142   :  { %166 = dma.smem_to_hbm %s315_s26, 16, %s433_s6, [#allocation13]  }
 0x143   :  { %s182_s29 = spop %181  ;;  %p292_p7 = scmp.ne.s32.totalorder %s432_s5, %s291_s0 }
 0x144   :  { %150 = sst [smem:[#allocation11]] %s182_s29  ;;  %p295_p8 = scmp.lt.u32.totalorder %s291_s0, %s432_s5 }
 0x146   :  { %p297_p9 = pnand %p295_p8, %p292_p7 }
 0x148   :  { %300 = shalt.err (!%p297_p9)
}
 0x149   :  { %s316_s11 = smov [#allocation11]  }
 0x14a   :  { %158 = dma.smem_to_hbm %s316_s11, 16, %s432_s5, [#allocation5]  }
 0x14b   :  { %307 = dma.done.wait [#allocation5], 16  }
 0x14c   :  { %308 = vsyncadd [#allocation5], 4294967280 }
 0x14d   :  { %309 = dma.done.wait [#allocation13], 16  }
 0x14e   :  { %310 = vsyncadd [#allocation13], 4294967280 }
 0x14f   :  { %173 = sfence }
 0x150   :  { %174 = vsyncpa [#allocation4], 1 }
 0x151   :  { %175 = vsyncpa [#allocation7], 1 }
 0x152   :  { %176 = vsyncpa [#allocation10], 1 }
 0x153   :  { %177 = vsyncpa [#allocation5], 1 }
 0x154   :  { %178 = vsyncpa [#allocation13], 1 }

</bundles_post_ra>
